<compile_context>
chip_gen: v7x
topology: tpu7x:2x2x1
jax: 0.10.0
libtpu: 0.0.40
codegen_flags: <defaults>
</compile_context>

<pallas_src>
import jax
import jax.numpy as jnp
from jax.experimental import pallas as pl
from jax.experimental.pallas import tpu as pltpu


def _transition_kernel(x_ref, scale_ref, shift_ref, w_ref, o_ref):
    # x_ref:     (8, TM, Cin)  pool-window-major, channels-last input tile (feed dtype)
    # scale_ref: (1, Cin) f32  folded BN scale = gamma / sqrt(var + eps)
    # shift_ref: (1, Cin) f32  folded BN shift = beta - mean * scale
    # w_ref:     (Cin, Cpad)   bf16 conv weight^T * 0.125, zero-padded in Cout
    # o_ref:     (TM, Cpad)
    tm = x_ref.shape[1]
    cin = x_ref.shape[2]

    # Hoist the (1,Cin)->(TM,Cin) broadcasts out of the unrolled window loop.
    scale = jnp.broadcast_to(scale_ref[...], (tm, cin))
    shift = jnp.broadcast_to(shift_ref[...], (tm, cin))

    # BN affine + ReLU per window element, running-accumulated -> 2x2x2 *sum* pool.
    # Pure VPU work on a (TM, Cin) accumulator; the 1/8 average factor lives in w_ref.
    acc = jnp.maximum(x_ref[0].astype(jnp.float32) * scale + shift, 0.0)
    for k in range(1, 8):  # static unroll over the 2x2x2 window
        acc = acc + jnp.maximum(x_ref[k].astype(jnp.float32) * scale + shift, 0.0)

    # 1x1x1 conv on the pooled tile (MXU).  bf16 operands + f32 accumulation keep the
    # MXU single-pass; valid to pool before conv because the conv is 1x1x1, bias-free.
    o_ref[...] = jnp.dot(acc.astype(w_ref.dtype), w_ref[...],
                         preferred_element_type=jnp.float32).astype(o_ref.dtype)


def _tile_and_vmem(M, Cin, Cpad, feed_bytes, out_bytes):
    """Generation-aware row-tile size and VMEM limit (v7x: 64 MiB VMEM, v5e/v6e: 128 MiB)."""
    try:
        vmem_cap = int(pltpu.get_tpu_info().vmem_capacity_bytes)
    except Exception:  # conservative default if the query is unavailable
        vmem_cap = 64 * 1024 * 1024
    small_vmem = vmem_cap <= 64 * 1024 * 1024
    vmem_limit = (48 if small_vmem else 96) * 1024 * 1024
    tm_cap = 256 if small_vmem else 1024

    # Per-tile VMEM estimate: double-buffered input/output tiles + resident constant
    # operands (weights, scale/shift; still double-buffered -- pl.Buffered(1) would
    # reclaim a little on v7x but is skipped for lowering safety) + live f32 temporaries.
    per_row = 2 * 8 * Cin * feed_bytes + 2 * Cpad * out_bytes + 4 * Cin * 4
    const = 2 * (Cin * Cpad * 2 + 2 * Cin * 4) + (2 << 20)
    budget = int(vmem_limit * 0.7)
    if budget > const:
        tm_fit = max(8, ((budget - const) // max(per_row, 1)) // 8 * 8)
    else:
        tm_fit = 8
    tm_cap = max(8, min(tm_cap, tm_fit))

    if M < 8:
        tm = M  # block equals the full (tiny) row dim
    else:
        tm = max(8, (min(tm_cap, M) // 8) * 8)
        if -(-M // tm) < 2 and M >= 16:
            # keep >= 2 grid steps so the "parallel" axis can shard across v7x's 2 TCs
            tm = max(8, ((-(-M // 2) + 7) // 8) * 8)
    return tm, vmem_limit


def transition_forward(x_ncdhw, gamma, beta, conv_w, *, eps=1e-5,
                       feed_dtype=jnp.bfloat16, mxu_dtype=jnp.bfloat16):
    """x_ncdhw: (N, Cin, D, H, W); conv_w: (Cout, Cin). Returns (N, Cout, D/2, H/2, W/2)."""
    N, Cin, D, H, W = x_ncdhw.shape
    Cout = conv_w.shape[0]
    assert D % 2 == 0 and H % 2 == 0 and W % 2 == 0, "AvgPool3d(2,2) needs even D/H/W"
    Do, Ho, Wo = D // 2, H // 2, W // 2
    M = N * Do * Ho * Wo
    out_dtype = x_ncdhw.dtype

    # ---- BatchNorm3d batch statistics (training mode, biased var), from native x ----
    # One fused reduction pass over the original f32 tensor; single-pass variance is
    # clamped at 0 (can lose precision vs two-pass when |mean| >> std).
    xf = x_ncdhw.astype(jnp.float32)
    n_elems = jnp.float32(N * D * H * W)
    s = jnp.sum(xf, axis=(0, 2, 3, 4))
    ss = jnp.sum(xf * xf, axis=(0, 2, 3, 4))
    mean = s / n_elems
    var = jnp.maximum(ss / n_elems - mean * mean, 0.0)
    scale_v = gamma.astype(jnp.float32) / jnp.sqrt(var + eps)
    shift_v = beta.astype(jnp.float32) - mean * scale_v
    scale = scale_v.reshape(1, Cin)
    shift = shift_v.reshape(1, Cin)

    # ---- relayout: NCDHW -> (8, M, Cin) window-major channels-last; bf16 cast fused ----
    x_r = x_ncdhw.reshape(N, Cin, Do, 2, Ho, 2, Wo, 2)
    x_win = jnp.transpose(x_r, (3, 5, 7, 0, 2, 4, 6, 1)).reshape(8, M, Cin)
    x_win = x_win.astype(feed_dtype)

    # conv weight: (Cout, Cin) -> (Cin, Cpad); 1/8 pool factor folded in; zero-padded so
    # output stores are lane-dense; kept in bf16 for a single-pass MXU.
    Cpad = max(128, ((Cout + 127) // 128) * 128)
    w = jnp.transpose(conv_w).astype(jnp.float32) * 0.125
    w = jnp.pad(w, ((0, 0), (0, Cpad - Cout))).astype(mxu_dtype)

    feed_bytes = jnp.dtype(feed_dtype).itemsize
    out_bytes = jnp.dtype(out_dtype).itemsize
    tm, vmem_limit = _tile_and_vmem(M, Cin, Cpad, feed_bytes, out_bytes)

    grid = (pl.cdiv(M, tm),)  # ragged last tile handled by Pallas (no jnp.pad pass)
    out_flat = pl.pallas_call(
        _transition_kernel,
        out_shape=jax.ShapeDtypeStruct((M, Cpad), out_dtype),
        grid_spec=pltpu.PrefetchScalarGridSpec(
            num_scalar_prefetch=0,
            grid=grid,
            in_specs=[
                pl.BlockSpec((8, tm, Cin), lambda i: (0, i, 0)),
                pl.BlockSpec((1, Cin), lambda i: (0, 0)),
                pl.BlockSpec((1, Cin), lambda i: (0, 0)),
                pl.BlockSpec((Cin, Cpad), lambda i: (0, 0)),
            ],
            out_specs=pl.BlockSpec((tm, Cpad), lambda i: (i, 0)),
        ),
        compiler_params=pltpu.CompilerParams(
            dimension_semantics=("parallel",),   # megacore-shardable grid axis
            vmem_limit_bytes=vmem_limit,
        ),
    )(x_win, scale, shift, w)

    # Strip the Cout lane padding and return NCDHW to match the PyTorch module.
    out = out_flat[:, :Cout].reshape(N, Do, Ho, Wo, Cout)
    return jnp.transpose(out, (0, 4, 1, 2, 3)).astype(out_dtype)


def _reference(x, gamma, beta, conv_w, eps=1e-5):
    mean = jnp.mean(x, axis=(0, 2, 3, 4), keepdims=True)
    var = jnp.mean((x - mean) ** 2, axis=(0, 2, 3, 4), keepdims=True)
    y = (x - mean) / jnp.sqrt(var + eps)
    y = y * gamma[None, :, None, None, None] + beta[None, :, None, None, None]
    y = jnp.maximum(y, 0.0)
    z = jnp.einsum('ncdhw,oc->nodhw', y, conv_w)
    Nn, Co, D, H, W = z.shape
    z = z.reshape(Nn, Co, D // 2, 2, H // 2, 2, W // 2, 2)
    return z.mean(axis=(3, 5, 7))


if __name__ == "__main__":
    key = jax.random.PRNGKey(0)
    k1, k2 = jax.random.split(key)
    N, Cin, Cout, D, H, W = 2, 4, 2, 8, 8, 8

    x = jax.random.normal(k1, (N, Cin, D, H, W), dtype=jnp.float32)
    # Deterministic parameter init (BatchNorm affine + 1x1x1 conv weight, no bias).
    gamma = 1.0 + 0.1 * jnp.arange(Cin, dtype=jnp.float32)
    beta = 0.05 * jnp.arange(Cin, dtype=jnp.float32) - 0.1
    conv_w = 0.5 * jax.random.normal(k2, (Cout, Cin), dtype=jnp.float32)

    fwd = jax.jit(transition_forward)
    out = jax.block_until_ready(fwd(x, gamma, beta, conv_w))

    ref = _reference(x, gamma, beta, conv_w)
    assert out.shape == (N, Cout, D // 2, H // 2, W // 2)
    # Default path feeds the kernel + MXU in bf16 -> tolerance sized for bf16 rounding.
    max_err = float(jnp.max(jnp.abs(out - ref)))
    assert jnp.allclose(out, ref, atol=3e-2, rtol=3e-2), f"max abs err {max_err}"
    print("KERNEL_OK")
</pallas_src>

<mosaic_0001>
module attributes {stable_mosaic.version = 11 : i64} {
  func.func @_transition_kernel(%arg0: i32, %arg1: memref<8x64x4xbf16, #tpu.memory_space<vmem>>, %arg2: memref<1x4xf32, #tpu.memory_space<vmem>>, %arg3: memref<1x4xf32, #tpu.memory_space<vmem>>, %arg4: memref<4x128xbf16, #tpu.memory_space<vmem>>, %arg5: memref<64x128xf32, #tpu.memory_space<vmem>>) attributes {dimension_semantics = [#tpu.dimension_semantics<parallel>], iteration_bounds = array<i64: 2>, scalar_prefetch = 0 : i64, scratch_operands = 0 : i64, tpu.core_type = #tpu.core_type<tc>, window_params = [{transform_indices = @transform_0, window_bounds = array<i64: 8, 64, 4>}, {pipeline_mode = #tpu.pipeline_mode<synchronous>, transform_indices = @transform_1, window_bounds = array<i64: 1, 4>}, {pipeline_mode = #tpu.pipeline_mode<synchronous>, transform_indices = @transform_2, window_bounds = array<i64: 1, 4>}, {pipeline_mode = #tpu.pipeline_mode<synchronous>, transform_indices = @transform_3, window_bounds = array<i64: 4, 128>}, {transform_indices = @transform_4, window_bounds = array<i64: 64, 128>}]} {
    %c0 = arith.constant 0 : index
    %c0_0 = arith.constant 0 : index
    %0 = vector.load %arg2[%c0, %c0_0] : memref<1x4xf32, #tpu.memory_space<vmem>>, vector<1x4xf32>
    %1 = vector.shape_cast %0 : vector<1x4xf32> to vector<1x4xf32>
    %2 = vector.broadcast %1 : vector<1x4xf32> to vector<64x4xf32>
    %c0_1 = arith.constant 0 : index
    %c0_2 = arith.constant 0 : index
    %3 = vector.load %arg3[%c0_1, %c0_2] : memref<1x4xf32, #tpu.memory_space<vmem>>, vector<1x4xf32>
    %4 = vector.shape_cast %3 : vector<1x4xf32> to vector<1x4xf32>
    %5 = vector.broadcast %4 : vector<1x4xf32> to vector<64x4xf32>
    %c0_3 = arith.constant 0 : index
    %c0_4 = arith.constant 0 : index
    %c0_5 = arith.constant 0 : index
    %6 = vector.load %arg1[%c0_3, %c0_4, %c0_5] : memref<8x64x4xbf16, #tpu.memory_space<vmem>>, vector<1x64x4xbf16>
    %7 = vector.shape_cast %6 : vector<1x64x4xbf16> to vector<64x4xbf16>
    %8 = arith.extf %7 : vector<64x4xbf16> to vector<64x4xf32>
    %9 = arith.mulf %8, %2 : vector<64x4xf32>
    %10 = arith.addf %9, %5 : vector<64x4xf32>
    %cst = arith.constant 0.000000e+00 : f32
    %11 = vector.broadcast %cst : f32 to vector<64x4xf32>
    %12 = arith.maximumf %10, %11 : vector<64x4xf32>
    %c1 = arith.constant 1 : index
    %c0_6 = arith.constant 0 : index
    %c0_7 = arith.constant 0 : index
    %13 = vector.load %arg1[%c1, %c0_6, %c0_7] : memref<8x64x4xbf16, #tpu.memory_space<vmem>>, vector<1x64x4xbf16>
    %14 = vector.shape_cast %13 : vector<1x64x4xbf16> to vector<64x4xbf16>
    %15 = arith.extf %14 : vector<64x4xbf16> to vector<64x4xf32>
    %16 = arith.mulf %15, %2 : vector<64x4xf32>
    %17 = arith.addf %16, %5 : vector<64x4xf32>
    %cst_8 = arith.constant 0.000000e+00 : f32
    %18 = vector.broadcast %cst_8 : f32 to vector<64x4xf32>
    %19 = arith.maximumf %17, %18 : vector<64x4xf32>
    %20 = arith.addf %12, %19 : vector<64x4xf32>
    %c2 = arith.constant 2 : index
    %c0_9 = arith.constant 0 : index
    %c0_10 = arith.constant 0 : index
    %21 = vector.load %arg1[%c2, %c0_9, %c0_10] : memref<8x64x4xbf16, #tpu.memory_space<vmem>>, vector<1x64x4xbf16>
    %22 = vector.shape_cast %21 : vector<1x64x4xbf16> to vector<64x4xbf16>
    %23 = arith.extf %22 : vector<64x4xbf16> to vector<64x4xf32>
    %24 = arith.mulf %23, %2 : vector<64x4xf32>
    %25 = arith.addf %24, %5 : vector<64x4xf32>
    %cst_11 = arith.constant 0.000000e+00 : f32
    %26 = vector.broadcast %cst_11 : f32 to vector<64x4xf32>
    %27 = arith.maximumf %25, %26 : vector<64x4xf32>
    %28 = arith.addf %20, %27 : vector<64x4xf32>
    %c3 = arith.constant 3 : index
    %c0_12 = arith.constant 0 : index
    %c0_13 = arith.constant 0 : index
    %29 = vector.load %arg1[%c3, %c0_12, %c0_13] : memref<8x64x4xbf16, #tpu.memory_space<vmem>>, vector<1x64x4xbf16>
    %30 = vector.shape_cast %29 : vector<1x64x4xbf16> to vector<64x4xbf16>
    %31 = arith.extf %30 : vector<64x4xbf16> to vector<64x4xf32>
    %32 = arith.mulf %31, %2 : vector<64x4xf32>
    %33 = arith.addf %32, %5 : vector<64x4xf32>
    %cst_14 = arith.constant 0.000000e+00 : f32
    %34 = vector.broadcast %cst_14 : f32 to vector<64x4xf32>
    %35 = arith.maximumf %33, %34 : vector<64x4xf32>
    %36 = arith.addf %28, %35 : vector<64x4xf32>
    %c4 = arith.constant 4 : index
    %c0_15 = arith.constant 0 : index
    %c0_16 = arith.constant 0 : index
    %37 = vector.load %arg1[%c4, %c0_15, %c0_16] : memref<8x64x4xbf16, #tpu.memory_space<vmem>>, vector<1x64x4xbf16>
    %38 = vector.shape_cast %37 : vector<1x64x4xbf16> to vector<64x4xbf16>
    %39 = arith.extf %38 : vector<64x4xbf16> to vector<64x4xf32>
    %40 = arith.mulf %39, %2 : vector<64x4xf32>
    %41 = arith.addf %40, %5 : vector<64x4xf32>
    %cst_17 = arith.constant 0.000000e+00 : f32
    %42 = vector.broadcast %cst_17 : f32 to vector<64x4xf32>
    %43 = arith.maximumf %41, %42 : vector<64x4xf32>
    %44 = arith.addf %36, %43 : vector<64x4xf32>
    %c5 = arith.constant 5 : index
    %c0_18 = arith.constant 0 : index
    %c0_19 = arith.constant 0 : index
    %45 = vector.load %arg1[%c5, %c0_18, %c0_19] : memref<8x64x4xbf16, #tpu.memory_space<vmem>>, vector<1x64x4xbf16>
    %46 = vector.shape_cast %45 : vector<1x64x4xbf16> to vector<64x4xbf16>
    %47 = arith.extf %46 : vector<64x4xbf16> to vector<64x4xf32>
    %48 = arith.mulf %47, %2 : vector<64x4xf32>
    %49 = arith.addf %48, %5 : vector<64x4xf32>
    %cst_20 = arith.constant 0.000000e+00 : f32
    %50 = vector.broadcast %cst_20 : f32 to vector<64x4xf32>
    %51 = arith.maximumf %49, %50 : vector<64x4xf32>
    %52 = arith.addf %44, %51 : vector<64x4xf32>
    %c6 = arith.constant 6 : index
    %c0_21 = arith.constant 0 : index
    %c0_22 = arith.constant 0 : index
    %53 = vector.load %arg1[%c6, %c0_21, %c0_22] : memref<8x64x4xbf16, #tpu.memory_space<vmem>>, vector<1x64x4xbf16>
    %54 = vector.shape_cast %53 : vector<1x64x4xbf16> to vector<64x4xbf16>
    %55 = arith.extf %54 : vector<64x4xbf16> to vector<64x4xf32>
    %56 = arith.mulf %55, %2 : vector<64x4xf32>
    %57 = arith.addf %56, %5 : vector<64x4xf32>
    %cst_23 = arith.constant 0.000000e+00 : f32
    %58 = vector.broadcast %cst_23 : f32 to vector<64x4xf32>
    %59 = arith.maximumf %57, %58 : vector<64x4xf32>
    %60 = arith.addf %52, %59 : vector<64x4xf32>
    %c7 = arith.constant 7 : index
    %c0_24 = arith.constant 0 : index
    %c0_25 = arith.constant 0 : index
    %61 = vector.load %arg1[%c7, %c0_24, %c0_25] : memref<8x64x4xbf16, #tpu.memory_space<vmem>>, vector<1x64x4xbf16>
    %62 = vector.shape_cast %61 : vector<1x64x4xbf16> to vector<64x4xbf16>
    %63 = arith.extf %62 : vector<64x4xbf16> to vector<64x4xf32>
    %64 = arith.mulf %63, %2 : vector<64x4xf32>
    %65 = arith.addf %64, %5 : vector<64x4xf32>
    %cst_26 = arith.constant 0.000000e+00 : f32
    %66 = vector.broadcast %cst_26 : f32 to vector<64x4xf32>
    %67 = arith.maximumf %65, %66 : vector<64x4xf32>
    %68 = arith.addf %60, %67 : vector<64x4xf32>
    %69 = arith.truncf %68 : vector<64x4xf32> to vector<64x4xbf16>
    %c0_27 = arith.constant 0 : index
    %c0_28 = arith.constant 0 : index
    %70 = vector.load %arg4[%c0_27, %c0_28] : memref<4x128xbf16, #tpu.memory_space<vmem>>, vector<4x128xbf16>
    %cst_29 = arith.constant dense<0.000000e+00> : vector<64x128xf32>
    %71 = tpu.matmul %69, %70, %cst_29 {dimension_numbers = #tpu.dot_dimension_numbers<[1], [0], [0], [1], [0, 0, 1, 1], [], []>} : vector<64x4xbf16>, vector<4x128xbf16>, vector<64x128xf32> -> vector<64x128xf32>
    %c0_30 = arith.constant 0 : index
    %c0_31 = arith.constant 0 : index
    %72 = vector.load %arg5[%c0_30, %c0_31] : memref<64x128xf32, #tpu.memory_space<vmem>>, vector<64x128xf32>
    tpu.vector_store %arg5[%c0_30, %c0_31], %71 {strides = array<i32>} : memref<64x128xf32, #tpu.memory_space<vmem>>, vector<64x128xf32>,
    return
  }
  func.func @transform_0(%arg0: i32) -> (i32, i32, i32) {
    %c0_i32 = arith.constant 0 : i32
    %c0_i32_0 = arith.constant 0 : i32
    %c0_i32_1 = arith.constant 0 : i32
    return %c0_i32, %arg0, %c0_i32_0 : i32, i32, i32
  }
  func.func @transform_1(%arg0: i32) -> (i32, i32) {
    %c0_i32 = arith.constant 0 : i32
    %c0_i32_0 = arith.constant 0 : i32
    %c0_i32_1 = arith.constant 0 : i32
    return %c0_i32, %c0_i32_0 : i32, i32
  }
  func.func @transform_2(%arg0: i32) -> (i32, i32) {
    %c0_i32 = arith.constant 0 : i32
    %c0_i32_0 = arith.constant 0 : i32
    %c0_i32_1 = arith.constant 0 : i32
    return %c0_i32, %c0_i32_0 : i32, i32
  }
  func.func @transform_3(%arg0: i32) -> (i32, i32) {
    %c0_i32 = arith.constant 0 : i32
    %c0_i32_0 = arith.constant 0 : i32
    %c0_i32_1 = arith.constant 0 : i32
    return %c0_i32, %c0_i32_0 : i32, i32
  }
  func.func @transform_4(%arg0: i32) -> (i32, i32) {
    %c0_i32 = arith.constant 0 : i32
    %c0_i32_0 = arith.constant 0 : i32
    return %arg0, %c0_i32 : i32, i32
  }
}

</mosaic_0001>

<bundles_post_ra>
// kernel: transition_forward.1
= control target key start
LH: loop header
LB: loop body
LE: loop exit
PB: predicated region body
PF: predicated region fallthrough
CT: control target
= control target key end

     0   :  { %s1376_s15 = smov 0   ;;  %s1378_s16 = smov 0   ;;  %s1675_s0 = inlined_call_operand.vmem [shape: bf16[8,128,4], index: 0, kind: input, shape index: {}]   ;;  %s1676_s1 = inlined_call_operand.vmem [shape: f32[1,4], index: 1, kind: input, shape index: {}]   ;;  %s1677_s2 = inlined_call_operand.vmem [shape: f32[1,4], index: 2, kind: input, shape index: {}]   ;;  %s1678_s3 = inlined_call_operand.vmem [shape: bf16[4,128], index: 3, kind: input, shape index: {}]   ;;  %s1679_s4 = inlined_call_operand.vmem [shape: f32[128,128], index: 4, kind: output, shape index: {}]  }
   0x1   :  { %s1380_s17 = smov 0  }
   0x2 LB: > { %s1049_s18 = sadd.s32 4294967295, %s1349_s17   ;;  %s1393_s19 = sadd.s32 1, %s1349_s17   ;;  %s1349_s17 = sphi %s1380_s17, %s1682_s17   ;;  %s1345_s16 = sphi %s1378_s16, %s1681_s16   ;;  %s1341_s15 = sphi %s1376_s15, %s1680_s15  }
   0x3   : > { %s18_s20 = ssub.s32 %s1349_s17, %s1393_s19  ;;  %s21_s21 = sadd.s32 1, %s1345_s16 }
   0x4   : > { %p19_p0 = scmp.eq.s32.totalorder %s18_s20, 0  ;;  %p28_p1 = scmp.ne.s32.totalorder %s1345_s16, %s1341_s15 }
   0x5   : > { %p29_p2 = scmp.eq.s32.totalorder %s1349_s17, 0  ;;  %p1052_p4 = scmp.ge.s32.totalorder %s1349_s17, 2 }
   0x6   : > { %s1402_s22 = scalar_select %p19_p0, %s1345_s16, %s21_s21  }
   0x7   : > { %p30_p3 = por %p29_p2, %p28_p1  ;;  %152 = sbr.rel (%p1052_p4) target bundleno = 34 (0x22), region = 28 }
   0xe   : > { %155 = sbr.rel (!%p30_p3) target bundleno = 34 (0x22), region = 32  ;;  %s157_s23 = sand.u32 (%p30_p3), 1, %s1345_s16  }
   0xf   : > { %s1124_s24 = sshll.u32 (%p30_p3), %s1349_s17, 5  ;;  %s1053_s25 = sshll.u32 (%p30_p3), %s157_s23, 8 }
  0x10   : > { %s1410_s28 = scalar_lea.vmem (%p30_p3), %s1675_s0, %s1124_s24  ;;  %s1415_s29 = scalar_lea.vmem (%p30_p3), [#allocation2], %s1053_s25 }
  0x11   : > { %v178_v0 = vld [vmem:[%s1410_s28] sm:$0xff] (%p30_p3)   ;;  %v182_v1 = vld [vmem:[%s1410_s28 + $0x8] sm:$0xff] (%p30_p3)   ;;  %v186_v2 = vld [vmem:[%s1410_s28 + $0x10] sm:$0xff] (%p30_p3)  }
  0x12   : > { %179 = vst [vmem:[%s1415_s29] sm:$0xff] (%p30_p3), %v178_v0   ;;  %183 = vst [vmem:[%s1415_s29 + $0x8] sm:$0xff] (%p30_p3), %v182_v1   ;;  %v190_v3 = vld [vmem:[%s1410_s28 + $0x18] sm:$0xff] (%p30_p3)   ;;  %v194_v4 = vld [vmem:[%s1410_s28 + $0x40] sm:$0xff] (%p30_p3)  }
  0x13   : > { %187 = vst [vmem:[%s1415_s29 + $0x10] sm:$0xff] (%p30_p3), %v186_v2   ;;  %v198_v5 = vld [vmem:[%s1410_s28 + $0x48] sm:$0xff] (%p30_p3)   ;;  %191 = vst [vmem:[%s1415_s29 + $0x18] sm:$0xff] (%p30_p3), %v190_v3   ;;  %v202_v6 = vld [vmem:[%s1410_s28 + $0x50] sm:$0xff] (%p30_p3)  }
  0x14   : > { %195 = vst [vmem:[%s1415_s29 + $0x20] sm:$0xff] (%p30_p3), %v194_v4   ;;  %199 = vst [vmem:[%s1415_s29 + $0x28] sm:$0xff] (%p30_p3), %v198_v5   ;;  %v206_v7 = vld [vmem:[%s1410_s28 + $0x58] sm:$0xff] (%p30_p3)   ;;  %v210_v8 = vld [vmem:[%s1410_s28 + $0x80] sm:$0xff] (%p30_p3)  }
  0x15   : > { %203 = vst [vmem:[%s1415_s29 + $0x30] sm:$0xff] %v202_v6   ;;  %207 = vst [vmem:[%s1415_s29 + $0x38] sm:$0xff] %v206_v7   ;;  %v214_v9 = vld [vmem:[%s1410_s28 + $0x88] sm:$0xff]   ;;  %v218_v10 = vld [vmem:[%s1410_s28 + $0x90] sm:$0xff]  }
  0x16   : > { %211 = vst [vmem:[%s1415_s29 + $0x40] sm:$0xff] %v210_v8   ;;  %v222_v11 = vld [vmem:[%s1410_s28 + $0x98] sm:$0xff]   ;;  %215 = vst [vmem:[%s1415_s29 + $0x48] sm:$0xff] %v214_v9   ;;  %v226_v12 = vld [vmem:[%s1410_s28 + $0xc0] sm:$0xff]  }
  0x17   : > { %219 = vst [vmem:[%s1415_s29 + $0x50] sm:$0xff] %v218_v10   ;;  %223 = vst [vmem:[%s1415_s29 + $0x58] sm:$0xff] %v222_v11   ;;  %v230_v13 = vld [vmem:[%s1410_s28 + $0xc8] sm:$0xff]   ;;  %v234_v14 = vld [vmem:[%s1410_s28 + $0xd0] sm:$0xff]  }
  0x18   : > { %227 = vst [vmem:[%s1415_s29 + $0x60] sm:$0xff] %v226_v12   ;;  %231 = vst [vmem:[%s1415_s29 + $0x68] sm:$0xff] %v230_v13   ;;  %v238_v15 = vld [vmem:[%s1410_s28 + $0xd8] sm:$0xff]   ;;  %v242_v16 = vld [vmem:[%s1410_s28 + $0x100] sm:$0xff]  }
  0x19   : > { %235 = vst [vmem:[%s1415_s29 + $0x70] sm:$0xff] %v234_v14   ;;  %v246_v17 = vld [vmem:[%s1410_s28 + $0x108] sm:$0xff]   ;;  %239 = vst [vmem:[%s1415_s29 + $0x78] sm:$0xff] %v238_v15   ;;  %v250_v18 = vld [vmem:[%s1410_s28 + $0x110] sm:$0xff]  }
  0x1a   : > { %243 = vst [vmem:[%s1415_s29 + $0x80] sm:$0xff] %v242_v16   ;;  %247 = vst [vmem:[%s1415_s29 + $0x88] sm:$0xff] %v246_v17   ;;  %v254_v19 = vld [vmem:[%s1410_s28 + $0x118] sm:$0xff]   ;;  %v258_v20 = vld [vmem:[%s1410_s28 + $0x140] sm:$0xff]  }
  0x1b   : > { %251 = vst [vmem:[%s1415_s29 + $0x90] sm:$0xff] %v250_v18   ;;  %255 = vst [vmem:[%s1415_s29 + $0x98] sm:$0xff] %v254_v19   ;;  %v262_v21 = vld [vmem:[%s1410_s28 + $0x148] sm:$0xff]   ;;  %v266_v22 = vld [vmem:[%s1410_s28 + $0x150] sm:$0xff]  }
  0x1c   : > { %259 = vst [vmem:[%s1415_s29 + $0xa0] sm:$0xff] %v258_v20   ;;  %v270_v23 = vld [vmem:[%s1410_s28 + $0x158] sm:$0xff]   ;;  %263 = vst [vmem:[%s1415_s29 + $0xa8] sm:$0xff] %v262_v21   ;;  %v274_v24 = vld [vmem:[%s1410_s28 + $0x180] sm:$0xff]  }
  0x1d   : > { %267 = vst [vmem:[%s1415_s29 + $0xb0] sm:$0xff] %v266_v22   ;;  %271 = vst [vmem:[%s1415_s29 + $0xb8] sm:$0xff] %v270_v23   ;;  %v278_v25 = vld [vmem:[%s1410_s28 + $0x188] sm:$0xff]   ;;  %v282_v26 = vld [vmem:[%s1410_s28 + $0x190] sm:$0xff]  }
  0x1e   : > { %275 = vst [vmem:[%s1415_s29 + $0xc0] sm:$0xff] %v274_v24   ;;  %279 = vst [vmem:[%s1415_s29 + $0xc8] sm:$0xff] %v278_v25   ;;  %v286_v27 = vld [vmem:[%s1410_s28 + $0x198] sm:$0xff]   ;;  %v290_v28 = vld [vmem:[%s1410_s28 + $0x1c0] sm:$0xff]  }
  0x1f   : > { %283 = vst [vmem:[%s1415_s29 + $0xd0] sm:$0xff] %v282_v26   ;;  %v294_v29 = vld [vmem:[%s1410_s28 + $0x1c8] sm:$0xff]   ;;  %287 = vst [vmem:[%s1415_s29 + $0xd8] sm:$0xff] %v286_v27   ;;  %v298_v30 = vld [vmem:[%s1410_s28 + $0x1d0] sm:$0xff]  }
  0x20   : > { %291 = vst [vmem:[%s1415_s29 + $0xe0] sm:$0xff] %v290_v28   ;;  %295 = vst [vmem:[%s1415_s29 + $0xe8] sm:$0xff] %v294_v29   ;;  %v302_v31 = vld [vmem:[%s1410_s28 + $0x1d8] sm:$0xff]  }
  0x21   : > { %299 = vst [vmem:[%s1415_s29 + $0xf0] sm:$0xff] %v298_v30   ;;  %303 = vst [vmem:[%s1415_s29 + $0xf8] sm:$0xff] %v302_v31  }
  0x22 PF: > { %p1056_p5 = scmp.ge.s32.totalorder %s1349_s17, 1  ;;  %p455_p6 = scmp.lt.s32.totalorder %s1349_s17, 3 }
  0x24   : > { %p456_p7 = pnand %p1056_p5, %p455_p6 }
  0x25   : > { %v896_v32 = vld [vmem:[%s1678_s3] sm:$0x3] (!%p456_p7)  ;;  %vm910_vm0 = vcmask (!%p456_p7), 1041408   ;;  %s462_s6 = sand.u32 (!%p456_p7), 1, %s1341_s15   ;;  %vm897_vm1 = vcmask (!%p456_p7), 31744   ;;  %s1058_s13 = sshll.u32 (!%p456_p7), %s1049_s18, 3 }
  0x26   : > { %459 = sbr.rel (%p456_p7) target bundleno = 343 (0x157), region = 73  ;;  %1301 = vmatprep.subr.msk.bf16.mxu0 (!%p456_p7), %vm910_vm0, %v896_v32  ;;  %1302 = vmatprep.subr.msk.bf16.mxu1 (!%p456_p7), %vm910_vm0, %v896_v32  ;;  %v912_v33 = vsel (!%p456_p7), %vm910_vm0, %v896_v32, 0  ;;  %s1057_s7 = sshll.u32 (!%p456_p7), %s462_s6, 8  ;;  %v1487_v34 = vld [vmem:[%s1676_s1] ss:$0 sm:$0xff] (!%p456_p7) }
  0x27   : > { %1290 = vmatpush3.bf16.msra.mxu0 (!%p456_p7), %v912_v33  ;;  %1300 = vmatpush3.bf16.msra.mxu1 (!%p456_p7), %v912_v33  ;;  %s1489_s10 = scalar_lea.vmem (!%p456_p7), [#allocation2], %s1057_s7  ;;  %v1498_v43 = vld [vmem:[%s1677_s2] ss:$0 sm:$0xff] (!%p456_p7)  ;;  %p489_p8 = scmp.lt.s32.totalorder (!%p456_p7), %s1058_s13, 15 }
  0x28   : > { %v1126_v35 = vld [vmem:[%s1489_s10] sm:$0xff] (!%p456_p7)  }
  0x29   : > { %v1256_v36 = vld [vmem:[%s1489_s10 + $0x20] sm:$0xff] (!%p456_p7)   ;;  %v1127_v38 = vunpack.c.l.bf16 (!%p456_p7), %v1126_v35  ;;  %v1128_v39 = vunpack.c.h.bf16 (!%p456_p7), %v1126_v35 }
  0x2a   : > { %v1260_v37 = vld [vmem:[%s1489_s10 + $0x40] sm:$0xff] (!%p456_p7)   ;;  %v1143_v40 = vunpack.c.l.bf16 (!%p456_p7), %v1256_v36  ;;  %v1144_v41 = vunpack.c.h.bf16 (!%p456_p7), %v1256_v36 }
  0x2b   : > { %v1264_v42 = vld [vmem:[%s1489_s10 + $0x60] sm:$0xff] (!%p456_p7)   ;;  %v1159_v44 = vunpack.c.l.bf16 (!%p456_p7), %v1260_v37  ;;  %v1160_v45 = vunpack.c.h.bf16 (!%p456_p7), %v1260_v37  ;;  %v525_v48 = vmul.f32 (!%p456_p7), %v1127_v38, %v1487_v34  ;;  %v526_v49 = vmul.f32 (!%p456_p7), %v1128_v39, %v1487_v34 }
  0x2c   : > { %v1175_v46 = vunpack.c.l.bf16 (!%p456_p7), %v1264_v42  ;;  %v1176_v47 = vunpack.c.h.bf16 (!%p456_p7), %v1264_v42  ;;  %v566_v50 = vmul.f32 (!%p456_p7), %v1143_v40, %v1487_v34  ;;  %v567_v51 = vmul.f32 (!%p456_p7), %v1144_v41, %v1487_v34  ;;  %v1268_v0 = vld [vmem:[%s1489_s10 + $0x80] sm:$0xff] (!%p456_p7)   ;;  %v1254_v41 = vld [vmem:[%s1489_s10 + $0x10] sm:$0xff] (!%p456_p7)  }
  0x2d   : > { %v615_v52 = vmul.f32 %v1159_v44, %v1487_v34  ;;  %v616_v53 = vmul.f32 %v1160_v45, %v1487_v34  ;;  %v533_v56 = vadd.f32 %v1498_v43, %v525_v48  ;;  %v534_v57 = vadd.f32 %v1498_v43, %v526_v49  ;;  %v1272_v5 = vld [vmem:[%s1489_s10 + $0xa0] sm:$0xff]   ;;  %v1258_v42 = vld [vmem:[%s1489_s10 + $0x30] sm:$0xff]   ;;  %s1684_s13 = smov (!%p489_p8, %s1058_s13), 15 }
  0x2e   : > { %v664_v54 = vmul.f32 %v1175_v46, %v1487_v34  ;;  %v665_v55 = vmul.f32 %v1176_v47, %v1487_v34  ;;  %v574_v58 = vadd.f32 %v1498_v43, %v566_v50  ;;  %v575_v59 = vadd.f32 %v1498_v43, %v567_v51  ;;  %v1276_v6 = vld [vmem:[%s1489_s10 + $0xc0] sm:$0xff]   ;;  %s1059_s14 = sshll.u32 %s1684_s13, 3 }
  0x2f   : > { %v623_v60 = vadd.f32 %v1498_v43, %v615_v52  ;;  %v624_v61 = vadd.f32 %v1498_v43, %v616_v53  ;;  %v541_v1 = vmax.f32 %v533_v56, 0.0  ;;  %v542_v2 = vmax.f32 %v534_v57, 0.0  ;;  %v1280_v27 = vld [vmem:[%s1489_s10 + $0xe0] sm:$0xff]   ;;  %s492_s21 = scalar_lea.vmem %s1679_s4, %s1059_s14 }
  0x30   : > { %v672_v62 = vadd.f32 %v1498_v43, %v664_v54  ;;  %v673_v63 = vadd.f32 %v1498_v43, %v665_v55  ;;  %v582_v3 = vmax.f32 %v574_v58, 0.0  ;;  %v583_v4 = vmax.f32 %v575_v59, 0.0 }
  0x31   : > { %v631_v7 = vmax.f32 %v623_v60, 0.0  ;;  %v632_v8 = vmax.f32 %v624_v61, 0.0  ;;  %v1191_v13 = vunpack.c.l.bf16 %v1268_v0  ;;  %v1192_v14 = vunpack.c.h.bf16 %v1268_v0  ;;  %v1262_v0 = vld [vmem:[%s1489_s10 + $0x50] sm:$0xff]  }
  0x32   : > { %v680_v9 = vmax.f32 %v672_v62, 0.0  ;;  %v681_v10 = vmax.f32 %v673_v63, 0.0  ;;  %v590_v11 = vadd.f32 %v582_v3, %v541_v1  ;;  %v591_v12 = vadd.f32 %v583_v4, %v542_v2 }
  0x33   : > { %v1207_v15 = vunpack.c.l.bf16 %v1272_v5  ;;  %v1208_v16 = vunpack.c.h.bf16 %v1272_v5  ;;  %v1223_v17 = vunpack.c.l.bf16 %v1276_v6  ;;  %v1224_v18 = vunpack.c.h.bf16 %v1276_v6 }
  0x34   : > { %v639_v19 = vadd.f32 %v631_v7, %v590_v11  ;;  %v640_v20 = vadd.f32 %v632_v8, %v591_v12  ;;  %v713_v21 = vmul.f32 %v1191_v13, %v1487_v34  ;;  %v714_v22 = vmul.f32 %v1192_v14, %v1487_v34  ;;  %v1270_v14 = vld [vmem:[%s1489_s10 + $0x90] sm:$0xff]  }
  0x35   : > { %v762_v23 = vmul.f32 %v1207_v15, %v1487_v34  ;;  %v763_v24 = vmul.f32 %v1208_v16, %v1487_v34  ;;  %v811_v25 = vmul.f32 %v1223_v17, %v1487_v34  ;;  %v812_v26 = vmul.f32 %v1224_v18, %v1487_v34 }
  0x36   : > { %v688_v28 = vadd.f32 %v680_v9, %v639_v19  ;;  %v689_v29 = vadd.f32 %v681_v10, %v640_v20  ;;  %v721_v30 = vadd.f32 %v1498_v43, %v713_v21  ;;  %v722_v31 = vadd.f32 %v1498_v43, %v714_v22  ;;  %v1266_v9 = vld [vmem:[%s1489_s10 + $0x70] sm:$0xff]  }
  0x37   : > { %v770_v32 = vadd.f32 %v1498_v43, %v762_v23  ;;  %v771_v33 = vadd.f32 %v1498_v43, %v763_v24  ;;  %v819_v35 = vadd.f32 %v1498_v43, %v811_v25  ;;  %v820_v36 = vadd.f32 %v1498_v43, %v812_v26  ;;  %v1274_v23 = vld [vmem:[%s1489_s10 + $0xb0] sm:$0xff]  }
  0x38   : > { %v729_v37 = vmax.f32 %v721_v30, 0.0  ;;  %v730_v38 = vmax.f32 %v722_v31, 0.0  ;;  %v1239_v39 = vunpack.c.l.bf16 %v1280_v27  ;;  %v1240_v40 = vunpack.c.h.bf16 %v1280_v27 }
  0x39   : > { %v778_v44 = vmax.f32 %v770_v32, 0.0  ;;  %v779_v45 = vmax.f32 %v771_v33, 0.0  ;;  %v827_v46 = vmax.f32 %v819_v35, 0.0  ;;  %v828_v47 = vmax.f32 %v820_v36, 0.0 }
  0x3a   : > { %v737_v48 = vadd.f32 %v729_v37, %v688_v28  ;;  %v738_v49 = vadd.f32 %v730_v38, %v689_v29  ;;  %v860_v50 = vmul.f32 %v1239_v39, %v1487_v34  ;;  %v861_v51 = vmul.f32 %v1240_v40, %v1487_v34 }
  0x3b   : > { %v1135_v52 = vunpack.c.l.bf16 %v1254_v41  ;;  %v1136_v53 = vunpack.c.h.bf16 %v1254_v41  ;;  %v1151_v54 = vunpack.c.l.bf16 %v1258_v42  ;;  %v1152_v55 = vunpack.c.h.bf16 %v1258_v42 }
  0x3c   : > { %v786_v56 = vadd.f32 %v778_v44, %v737_v48  ;;  %v787_v57 = vadd.f32 %v779_v45, %v738_v49  ;;  %v868_v58 = vadd.f32 %v1498_v43, %v860_v50  ;;  %v869_v59 = vadd.f32 %v1498_v43, %v861_v51  ;;  %v1282_v51 = vld [vmem:[%s1489_s10 + $0xf0] sm:$0xff]  }
  0x3d   : > { %v529_v60 = vmul.f32 %v1135_v52, %v1487_v34  ;;  %v530_v61 = vmul.f32 %v1136_v53, %v1487_v34  ;;  %v570_v62 = vmul.f32 %v1151_v54, %v1487_v34  ;;  %v571_v63 = vmul.f32 %v1152_v55, %v1487_v34 }
  0x3e   : > { %v835_v1 = vadd.f32 %v827_v46, %v786_v56  ;;  %v836_v2 = vadd.f32 %v828_v47, %v787_v57  ;;  %v876_v3 = vmax.f32 %v868_v58, 0.0  ;;  %v877_v4 = vmax.f32 %v869_v59, 0.0  ;;  %v1278_v46 = vld [vmem:[%s1489_s10 + $0xd0] sm:$0xff]  }
  0x3f   : > { %v537_v5 = vadd.f32 %v1498_v43, %v529_v60  ;;  %v538_v6 = vadd.f32 %v1498_v43, %v530_v61  ;;  %v578_v7 = vadd.f32 %v1498_v43, %v570_v62  ;;  %v579_v8 = vadd.f32 %v1498_v43, %v571_v63  ;;  %v1253_v60 = vld [vmem:[%s1489_s10 + $0x8] sm:$0xff]  }
  0x40   : > { %v884_v10 = vadd.f32 %v876_v3, %v835_v1  ;;  %v885_v11 = vadd.f32 %v877_v4, %v836_v2  ;;  %v1167_v12 = vunpack.c.l.bf16 %v1262_v0  ;;  %v1168_v13 = vunpack.c.h.bf16 %v1262_v0 }
  0x41   : > { %v545_v15 = vmax.f32 %v537_v5, 0.0  ;;  %v546_v16 = vmax.f32 %v538_v6, 0.0  ;;  %v586_v17 = vmax.f32 %v578_v7, 0.0  ;;  %v587_v18 = vmax.f32 %v579_v8, 0.0 }
  0x42   : > { %v892_v19 = vpack.c.bf16 %v885_v11, %v884_v10  ;;  %v619_v20 = vmul.f32 %v1167_v12, %v1487_v34  ;;  %v620_v21 = vmul.f32 %v1168_v13, %v1487_v34  ;;  %v1183_v22 = vunpack.c.l.bf16 %v1266_v9 }
  0x43   : > { %v594_v24 = vadd.f32 %v586_v17, %v545_v15  ;;  %v595_v25 = vadd.f32 %v587_v18, %v546_v16  ;;  %v1184_v26 = vunpack.c.h.bf16 %v1266_v9  ;;  %v1199_v27 = vunpack.c.l.bf16 %v1270_v14  ;;  %v1257_v9 = vld [vmem:[%s1489_s10 + $0x28] sm:$0xff]  }
  0x44   : > { %1291 = vmatprep.mubr.msk.bf16.mxu0 %vm897_vm1, %v892_v19  ;;  %v627_v28 = vadd.f32 %v1498_v43, %v619_v20  ;;  %v628_v29 = vadd.f32 %v1498_v43, %v620_v21  ;;  %v668_v30 = vmul.f32 %v1183_v22, %v1487_v34  ;;  %v1200_v31 = vunpack.c.h.bf16 %v1270_v14  ;;  %v1261_v22 = vld [vmem:[%s1489_s10 + $0x48] sm:$0xff]  }
  0x45   : > { %v669_v32 = vmul.f32 %v1184_v26, %v1487_v34  ;;  %v717_v33 = vmul.f32 %v1199_v27, %v1487_v34  ;;  %v1215_v35 = vunpack.c.l.bf16 %v1274_v23  ;;  %v1216_v36 = vunpack.c.h.bf16 %v1274_v23 }
  0x46   : > { %v635_v37 = vmax.f32 %v627_v28, 0.0  ;;  %v636_v38 = vmax.f32 %v628_v29, 0.0  ;;  %v676_v39 = vadd.f32 %v1498_v43, %v668_v30  ;;  %v718_v40 = vmul.f32 %v1200_v31, %v1487_v34  ;;  %v1265_v31 = vld [vmem:[%s1489_s10 + $0x68] sm:$0xff]  }
  0x47   : > { %v677_v41 = vadd.f32 %v1498_v43, %v669_v32  ;;  %v725_v42 = vadd.f32 %v1498_v43, %v717_v33  ;;  %v766_v44 = vmul.f32 %v1215_v35, %v1487_v34  ;;  %v767_v45 = vmul.f32 %v1216_v36, %v1487_v34 }
  0x48   : > { %v643_v47 = vadd.f32 %v635_v37, %v594_v24  ;;  %v644_v48 = vadd.f32 %v636_v38, %v595_v25  ;;  %v684_v49 = vmax.f32 %v676_v39, 0.0  ;;  %v726_v50 = vadd.f32 %v1498_v43, %v718_v40  ;;  %v1269_v37 = vld [vmem:[%s1489_s10 + $0x88] sm:$0xff]  }
  0x49   : > { %v685_v52 = vmax.f32 %v677_v41, 0.0  ;;  %v733_v53 = vmax.f32 %v725_v42, 0.0  ;;  %v774_v54 = vadd.f32 %v1498_v43, %v766_v44  ;;  %v775_v55 = vadd.f32 %v1498_v43, %v767_v45 }
  0x4a   : > { %v692_v56 = vadd.f32 %v684_v49, %v643_v47  ;;  %v734_v57 = vmax.f32 %v726_v50, 0.0  ;;  %v1231_v58 = vunpack.c.l.bf16 %v1278_v46  ;;  %v1232_v59 = vunpack.c.h.bf16 %v1278_v46 }
  0x4b   : > { %v693_v61 = vadd.f32 %v685_v52, %v644_v48  ;;  %v782_v62 = vmax.f32 %v774_v54, 0.0  ;;  %v783_v63 = vmax.f32 %v775_v55, 0.0  ;;  %v1247_v0 = vunpack.c.l.bf16 %v1282_v51  ;;  %v1273_v55 = vld [vmem:[%s1489_s10 + $0xa8] sm:$0xff]  }
  0x4c   : > { %v741_v1 = vadd.f32 %v733_v53, %v692_v56  ;;  %v815_v2 = vmul.f32 %v1231_v58, %v1487_v34  ;;  %v816_v3 = vmul.f32 %v1232_v59, %v1487_v34  ;;  %v1248_v4 = vunpack.c.h.bf16 %v1282_v51 }
  0x4d   : > { %v742_v5 = vadd.f32 %v734_v57, %v693_v61  ;;  %v864_v6 = vmul.f32 %v1247_v0, %v1487_v34  ;;  %v1131_v7 = vunpack.c.l.bf16 %v1253_v60  ;;  %v1132_v8 = vunpack.c.h.bf16 %v1253_v60 }
  0x4e   : > { %v790_v10 = vadd.f32 %v782_v62, %v741_v1  ;;  %v823_v11 = vadd.f32 %v1498_v43, %v815_v2  ;;  %v824_v12 = vadd.f32 %v1498_v43, %v816_v3  ;;  %v865_v13 = vmul.f32 %v1248_v4, %v1487_v34  ;;  %v1277_v4 = vld [vmem:[%s1489_s10 + $0xc8] sm:$0xff]  }
  0x4f   : > { %v791_v14 = vadd.f32 %v783_v63, %v742_v5  ;;  %v872_v15 = vadd.f32 %v1498_v43, %v864_v6  ;;  %v527_v16 = vmul.f32 %v1131_v7, %v1487_v34  ;;  %v528_v17 = vmul.f32 %v1132_v8, %v1487_v34 }
  0x50   : > { %v831_v18 = vmax.f32 %v823_v11, 0.0  ;;  %v832_v19 = vmax.f32 %v824_v12, 0.0  ;;  %v873_v20 = vadd.f32 %v1498_v43, %v865_v13  ;;  %v1147_v21 = vunpack.c.l.bf16 %v1257_v9 }
  0x51   : > { %v880_v23 = vmax.f32 %v872_v15, 0.0  ;;  %v535_v24 = vadd.f32 %v1498_v43, %v527_v16  ;;  %v536_v25 = vadd.f32 %v1498_v43, %v528_v17  ;;  %v1148_v26 = vunpack.c.h.bf16 %v1257_v9  ;;  %v1281_v9 = vld [vmem:[%s1489_s10 + $0xe8] sm:$0xff]  }
  0x52   : > { %v839_v27 = vadd.f32 %v831_v18, %v790_v10  ;;  %v840_v28 = vadd.f32 %v832_v19, %v791_v14  ;;  %v881_v29 = vmax.f32 %v873_v20, 0.0  ;;  %v568_v30 = vmul.f32 %v1147_v21, %v1487_v34 }
  0x53   : > { %v543_v32 = vmax.f32 %v535_v24, 0.0  ;;  %v544_v33 = vmax.f32 %v536_v25, 0.0  ;;  %v569_v35 = vmul.f32 %v1148_v26, %v1487_v34  ;;  %v1163_v36 = vunpack.c.l.bf16 %v1261_v22 }
  0x54   : > { %v888_v38 = vadd.f32 %v880_v23, %v839_v27  ;;  %v889_v39 = vadd.f32 %v881_v29, %v840_v28  ;;  %v576_v40 = vadd.f32 %v1498_v43, %v568_v30  ;;  %v1164_v41 = vunpack.c.h.bf16 %v1261_v22  ;;  %v1255_v22 = vld [vmem:[%s1489_s10 + $0x18] sm:$0xff]  }
  0x55   : > { %v577_v42 = vadd.f32 %v1498_v43, %v569_v35  ;;  %v617_v44 = vmul.f32 %v1163_v36, %v1487_v34  ;;  %v1179_v45 = vunpack.c.l.bf16 %v1265_v31  ;;  %v1180_v46 = vunpack.c.h.bf16 %v1265_v31  ;;  %v1259_v36 = vld [vmem:[%s1489_s10 + $0x38] sm:$0xff]  }
  0x56   : > { %v894_v47 = vpack.c.bf16 %v889_v39, %v888_v38  ;;  %v584_v48 = vmax.f32 %v576_v40, 0.0  ;;  %v618_v49 = vmul.f32 %v1164_v41, %v1487_v34  ;;  %v1195_v50 = vunpack.c.l.bf16 %v1269_v37 }
  0x57   : > { %v585_v51 = vmax.f32 %v577_v42, 0.0  ;;  %v625_v52 = vadd.f32 %v1498_v43, %v617_v44  ;;  %v666_v53 = vmul.f32 %v1179_v45, %v1487_v34  ;;  %v667_v54 = vmul.f32 %v1180_v46, %v1487_v34  ;;  %v1263_v46 = vld [vmem:[%s1489_s10 + $0x58] sm:$0xff]  }
  0x58   : > { %1295 = vmatprep.mubr.msk.bf16.mxu1 %vm897_vm1, %v894_v47  ;;  %v592_v56 = vadd.f32 %v584_v48, %v543_v32  ;;  %v626_v57 = vadd.f32 %v1498_v43, %v618_v49  ;;  %v1196_v58 = vunpack.c.h.bf16 %v1269_v37  ;;  %v715_v59 = vmul.f32 %v1195_v50, %v1487_v34 }
  0x59   : > { %v593_v60 = vadd.f32 %v585_v51, %v544_v33  ;;  %v633_v61 = vmax.f32 %v625_v52, 0.0  ;;  %v674_v62 = vadd.f32 %v1498_v43, %v666_v53  ;;  %v675_v63 = vadd.f32 %v1498_v43, %v667_v54 }
  0x5a   : > { %v634_v0 = vmax.f32 %v626_v57, 0.0  ;;  %v716_v1 = vmul.f32 %v1196_v58, %v1487_v34  ;;  %v723_v2 = vadd.f32 %v1498_v43, %v715_v59  ;;  %v1211_v3 = vunpack.c.l.bf16 %v1273_v55  ;;  %v1267_v59 = vld [vmem:[%s1489_s10 + $0x78] sm:$0xff]  }
  0x5b   : > { %v641_v5 = vadd.f32 %v633_v61, %v592_v56  ;;  %v682_v6 = vmax.f32 %v674_v62, 0.0  ;;  %v683_v7 = vmax.f32 %v675_v63, 0.0  ;;  %v1212_v8 = vunpack.c.h.bf16 %v1273_v55 }
  0x5c   : > { %v642_v10 = vadd.f32 %v634_v0, %v593_v60  ;;  %v724_v11 = vadd.f32 %v1498_v43, %v716_v1  ;;  %v731_v12 = vmax.f32 %v723_v2, 0.0  ;;  %v764_v13 = vmul.f32 %v1211_v3, %v1487_v34  ;;  %v1271_v0 = vld [vmem:[%s1489_s10 + $0x98] sm:$0xff]  }
  0x5d   : > { %v690_v14 = vadd.f32 %v682_v6, %v641_v5  ;;  %v765_v15 = vmul.f32 %v1212_v8, %v1487_v34  ;;  %v1227_v16 = vunpack.c.l.bf16 %v1277_v4  ;;  %v1228_v17 = vunpack.c.h.bf16 %v1277_v4 }
  0x5e   : > { %v691_v18 = vadd.f32 %v683_v7, %v642_v10  ;;  %v732_v19 = vmax.f32 %v724_v11, 0.0  ;;  %v772_v20 = vadd.f32 %v1498_v43, %v764_v13  ;;  %v1243_v21 = vunpack.c.l.bf16 %v1281_v9 }
  0x5f   : > { %v739_v23 = vadd.f32 %v731_v12, %v690_v14  ;;  %v773_v24 = vadd.f32 %v1498_v43, %v765_v15  ;;  %v813_v25 = vmul.f32 %v1227_v16, %v1487_v34  ;;  %v814_v26 = vmul.f32 %v1228_v17, %v1487_v34  ;;  %v1275_v17 = vld [vmem:[%s1489_s10 + $0xb8] sm:$0xff]  }
  0x60   : > { %v740_v27 = vadd.f32 %v732_v19, %v691_v18  ;;  %v780_v28 = vmax.f32 %v772_v20, 0.0  ;;  %v1244_v29 = vunpack.c.h.bf16 %v1281_v9  ;;  %v862_v30 = vmul.f32 %v1243_v21, %v1487_v34 }
  0x61   : > { %v781_v31 = vmax.f32 %v773_v24, 0.0  ;;  %v821_v32 = vadd.f32 %v1498_v43, %v813_v25  ;;  %v822_v33 = vadd.f32 %v1498_v43, %v814_v26  ;;  %v1139_v35 = vunpack.c.l.bf16 %v1255_v22  ;;  %v1279_v26 = vld [vmem:[%s1489_s10 + $0xd8] sm:$0xff]  }
  0x62   : > { %v788_v37 = vadd.f32 %v780_v28, %v739_v23  ;;  %v863_v38 = vmul.f32 %v1244_v29, %v1487_v34  ;;  %v870_v39 = vadd.f32 %v1498_v43, %v862_v30  ;;  %v1140_v40 = vunpack.c.h.bf16 %v1255_v22 }
  0x63   : > { %v789_v41 = vadd.f32 %v781_v31, %v740_v27  ;;  %v829_v42 = vmax.f32 %v821_v32, 0.0  ;;  %v830_v44 = vmax.f32 %v822_v33, 0.0  ;;  %v531_v45 = vmul.f32 %v1139_v35, %v1487_v34 }
  0x64   : > { %v871_v47 = vadd.f32 %v1498_v43, %v863_v38  ;;  %v878_v48 = vmax.f32 %v870_v39, 0.0  ;;  %v532_v49 = vmul.f32 %v1140_v40, %v1487_v34  ;;  %v1155_v50 = vunpack.c.l.bf16 %v1259_v36 }
  0x65   : > { %v837_v51 = vadd.f32 %v829_v42, %v788_v37  ;;  %v838_v52 = vadd.f32 %v830_v44, %v789_v41  ;;  %v539_v53 = vadd.f32 %v1498_v43, %v531_v45  ;;  %v1156_v54 = vunpack.c.h.bf16 %v1259_v36  ;;  %v1283_v36 = vld [vmem:[%s1489_s10 + $0xf8] sm:$0xff]  }
  0x66   : > { %v879_v55 = vmax.f32 %v871_v47, 0.0  ;;  %v540_v56 = vadd.f32 %v1498_v43, %v532_v49  ;;  %v572_v57 = vmul.f32 %v1155_v50, %v1487_v34  ;;  %v1171_v58 = vunpack.c.l.bf16 %v1263_v46 }
  0x67   : > { %v886_v60 = vadd.f32 %v878_v48, %v837_v51  ;;  %v547_v61 = vmax.f32 %v539_v53, 0.0  ;;  %v573_v62 = vmul.f32 %v1156_v54, %v1487_v34  ;;  %v1172_v63 = vunpack.c.h.bf16 %v1263_v46 }
  0x68   : > { %v887_v1 = vadd.f32 %v879_v55, %v838_v52  ;;  %v548_v2 = vmax.f32 %v540_v56, 0.0  ;;  %v580_v3 = vadd.f32 %v1498_v43, %v572_v57  ;;  %v621_v4 = vmul.f32 %v1171_v58, %v1487_v34 }
  0x69   : > { %v581_v5 = vadd.f32 %v1498_v43, %v573_v62  ;;  %v622_v6 = vmul.f32 %v1172_v63, %v1487_v34  ;;  %v1187_v7 = vunpack.c.l.bf16 %v1267_v59  ;;  %v1188_v8 = vunpack.c.h.bf16 %v1267_v59 }
  0x6a   : > { %v893_v9 = vpack.c.bf16 %v887_v1, %v886_v60  ;;  %v588_v10 = vmax.f32 %v580_v3, 0.0  ;;  %v629_v11 = vadd.f32 %v1498_v43, %v621_v4  ;;  %v1203_v12 = vunpack.c.l.bf16 %v1271_v0 }
  0x6b   : > { %v589_v13 = vmax.f32 %v581_v5, 0.0  ;;  %v630_v14 = vadd.f32 %v1498_v43, %v622_v6  ;;  %v670_v15 = vmul.f32 %v1187_v7, %v1487_v34  ;;  %v671_v16 = vmul.f32 %v1188_v8, %v1487_v34 }
  0x6c   : > { %1292 = vmatmul.mubr.msk.bf16.vlgmr.msra.gmra.mrb[0].mxu0 %vm897_vm1, %v893_v9  ;;  %v596_v18 = vadd.f32 %v588_v10, %v547_v61  ;;  %v637_v19 = vmax.f32 %v629_v11, 0.0  ;;  %v1204_v20 = vunpack.c.h.bf16 %v1271_v0  ;;  %v719_v21 = vmul.f32 %v1203_v12, %v1487_v34 }
  0x6d   : > { %v597_v22 = vadd.f32 %v589_v13, %v548_v2  ;;  %v638_v23 = vmax.f32 %v630_v14, 0.0  ;;  %v678_v24 = vadd.f32 %v1498_v43, %v670_v15  ;;  %v679_v25 = vadd.f32 %v1498_v43, %v671_v16 }
  0x6e   : > { %v645_v27 = vadd.f32 %v637_v19, %v596_v18  ;;  %v720_v28 = vmul.f32 %v1204_v20, %v1487_v34  ;;  %v727_v29 = vadd.f32 %v1498_v43, %v719_v21  ;;  %v1219_v30 = vunpack.c.l.bf16 %v1275_v17 }
  0x6f   : > { %v646_v31 = vadd.f32 %v638_v23, %v597_v22  ;;  %v686_v32 = vmax.f32 %v678_v24, 0.0  ;;  %v687_v33 = vmax.f32 %v679_v25, 0.0  ;;  %v1220_v35 = vunpack.c.h.bf16 %v1275_v17 }
  0x70   : > { %v728_v37 = vadd.f32 %v1498_v43, %v720_v28  ;;  %v735_v38 = vmax.f32 %v727_v29, 0.0  ;;  %v768_v39 = vmul.f32 %v1219_v30, %v1487_v34  ;;  %v1235_v40 = vunpack.c.l.bf16 %v1279_v26 }
  0x71   : > { %v694_v41 = vadd.f32 %v686_v32, %v645_v27  ;;  %v695_v42 = vadd.f32 %v687_v33, %v646_v31  ;;  %v769_v44 = vmul.f32 %v1220_v35, %v1487_v34  ;;  %v1236_v45 = vunpack.c.h.bf16 %v1279_v26 }
  0x72   : > { %v736_v46 = vmax.f32 %v728_v37, 0.0  ;;  %v776_v47 = vadd.f32 %v1498_v43, %v768_v39  ;;  %v817_v48 = vmul.f32 %v1235_v40, %v1487_v34  ;;  %v1251_v49 = vunpack.c.l.bf16 %v1283_v36 }
  0x73   : > { %v743_v50 = vadd.f32 %v735_v38, %v694_v41  ;;  %v777_v51 = vadd.f32 %v1498_v43, %v769_v44  ;;  %v818_v52 = vmul.f32 %v1236_v45, %v1487_v34  ;;  %v1252_v53 = vunpack.c.h.bf16 %v1283_v36 }
  0x74   : > { %v744_v54 = vadd.f32 %v736_v46, %v695_v42  ;;  %v784_v55 = vmax.f32 %v776_v47, 0.0  ;;  %v825_v56 = vadd.f32 %v1498_v43, %v817_v48  ;;  %v866_v57 = vmul.f32 %v1251_v49, %v1487_v34 }
  0x75   : > { %v785_v58 = vmax.f32 %v777_v51, 0.0  ;;  %v826_v59 = vadd.f32 %v1498_v43, %v818_v52  ;;  %v867_v60 = vmul.f32 %v1252_v53, %v1487_v34 }
  0x76   : > { %v792_v61 = vadd.f32 %v784_v55, %v743_v50  ;;  %v833_v62 = vmax.f32 %v825_v56, 0.0  ;;  %v874_v63 = vadd.f32 %v1498_v43, %v866_v57 }
  0x77   : > { %v793_v0 = vadd.f32 %v785_v58, %v744_v54  ;;  %v834_v1 = vmax.f32 %v826_v59, 0.0  ;;  %v875_v2 = vadd.f32 %v1498_v43, %v867_v60 }
  0x78   : > { %v841_v3 = vadd.f32 %v833_v62, %v792_v61  ;;  %v882_v4 = vmax.f32 %v874_v63, 0.0 }
  0x79   : > { %v842_v5 = vadd.f32 %v834_v1, %v793_v0  ;;  %v883_v6 = vmax.f32 %v875_v2, 0.0 }
  0x7a   : > { %v890_v7 = vadd.f32 %v882_v4, %v841_v3 }
  0x7b   : > { %v891_v8 = vadd.f32 %v883_v6, %v842_v5 }
  0x7d   : > { %v895_v9 = vpack.c.bf16 %v891_v8, %v890_v7 }
  0x7f   : > { %1296 = vmatmul.mubr.msk.bf16.vlgmr.msra.gmra.mrb[0].mxu1 %vm897_vm1, %v895_v9 }
 0x13f   : > { %v1293_v34 = vpop.f32.mrb[0].mxu0 }
 0x140   : > { %981 = vst [vmem:[%s492_s21 + $0x10] sm:$0xff] %v1293_v34  ;;  %v948_v43 = vpop.f32.mrb[1].mxu0 }
 0x141   : > { %979 = vst [vmem:[%s492_s21] sm:$0xff] %v948_v43  ;;  %v1294_v10 = vpop.f32.mrb[2].mxu0 }
 0x142   : > { %982 = vst [vmem:[%s492_s21 + $0x18] sm:$0xff] %v1294_v10  ;;  %v951_v11 = vpop.f32.mrb[3].mxu0 }
 0x143   : > { %980 = vst [vmem:[%s492_s21 + $0x8] sm:$0xff] %v951_v11 }
 0x152   : > { %v1297_v12 = vpop.f32.mrb[0].mxu1 }
 0x153   : > { %985 = vst [vmem:[%s492_s21 + $0x30] sm:$0xff] %v1297_v12  ;;  %v964_v13 = vpop.f32.mrb[1].mxu1 }
 0x154   : > { %983 = vst [vmem:[%s492_s21 + $0x20] sm:$0xff] %v964_v13  ;;  %v1298_v14 = vpop.f32.mrb[2].mxu1 }
 0x155   : > { %986 = vst [vmem:[%s492_s21 + $0x38] sm:$0xff] %v1298_v14  ;;  %v967_v15 = vpop.f32.mrb[3].mxu1 }
 0x156   : > { %984 = vst [vmem:[%s492_s21 + $0x28] sm:$0xff] %v967_v15 }
 0x157 PF: > { %p11_p9 = scmp.ge.s32.totalorder %s1393_s19, 4   ;;  %s1680_s15 = smov %s1345_s16 }
 0x158   : > { %s1681_s16 = smov %s1402_s22  ;;  %s1682_s17 = smov %s1393_s19 }
 0x159   :  { %13 = sbr.rel (!%p11_p9) target bundleno = 2 (0x2), region = 119 }

</bundles_post_ra>
